<compile_context>
chip_gen: v5e
topology: v5e:2x2
jax: 0.10.0
libtpu: 0.0.40
codegen_flags: <defaults>
</compile_context>

<pallas_src>
import functools

import jax
import jax.numpy as jnp
from jax.experimental import pallas as pl
from jax.experimental.pallas import tpu as pltpu

LN_EPS = 1e-5          # torch.nn.LayerNorm default eps
SUBLANE = 8


def _round_up(a, b):
    return (a + b - 1) // b * b


def _cdiv(a, b):
    return -(-a // b)


# --------------------------------------------------------------------------- #
# Kernel: one row-tile of linear_out(relu(linear_in(layernorm(x))))
# --------------------------------------------------------------------------- #
def adapter_kernel(x_ref, g_ref, beta_ref, w1_ref, b1_ref, w2_ref, b2_ref, o_ref):
    x = x_ref[...].astype(jnp.float32)                        # (tm, D)

    # Single-pass LayerNorm statistics (per-row); clamp var >= 0 against
    # catastrophic cancellation of E[x^2] - mean^2.
    mean = jnp.mean(x, axis=-1, keepdims=True)
    ex2 = jnp.mean(x * x, axis=-1, keepdims=True)
    var = jnp.maximum(ex2 - mean * mean, 0.0)
    inv_std = jax.lax.rsqrt(var + LN_EPS)                      # EUP
    xn = (x - mean) * inv_std * g_ref[...] + beta_ref[...]

    # MXU matmuls: bf16 operands, f32 accumulation; elementwise stays f32.
    # TODO(synk): on v7x, fp8 (E4M3 + per-tensor scale folded into the bias)
    # weights would halve weight DMA and double MXU throughput.
    h = jnp.dot(xn.astype(w1_ref.dtype), w1_ref[...],
                preferred_element_type=jnp.float32)            # (tm, M)
    h = jnp.maximum(h + b1_ref[...], 0.0)
    y = jnp.dot(h.astype(w2_ref.dtype), w2_ref[...],
                preferred_element_type=jnp.float32)            # (tm, D)
    o_ref[...] = (y + b2_ref[...]).astype(o_ref.dtype)


# --------------------------------------------------------------------------- #
# Tiling / VMEM accounting
# --------------------------------------------------------------------------- #
def _vmem_caps():
    """(tile-choice budget, scoped vmem limit) from the running chip's VMEM."""
    cap = 64 * 1024 * 1024                    # conservative default (v7x per-TC)
    try:
        cap = int(getattr(pltpu.get_tpu_info(), "vmem_capacity_bytes", cap))
    except Exception:
        pass
    budget = max(16 * 1024 * 1024, int(cap * 0.75) - 8 * 1024 * 1024)
    limit = int(cap * 0.85)
    return budget, limit


def _choose_tm(n_rows, d, m, in_bytes, out_bytes, tm_target, vmem_budget):
    """Largest multiple-of-8 row tile fitting the VMEM budget, capped by the row
    count, keeping >= ~4 grid steps (pipeline overlap) and an even tile count
    (v7x megacore) when there is enough work."""
    # Pipelined buffers (x: Buffered(3); y: default 2) plus live in-kernel
    # temporaries: (4B x + 4B xn + 2B xn_bf16 + 4B y) per D-col = 14*D
    #              (4B h + 2B h_bf16)                 per M-col =  6*M
    per_row = 3 * d * in_bytes + 2 * d * out_bytes + 14 * d + 6 * m
    # Single-buffered bf16 weights + f32 LN params / biases.
    fixed = 2 * (2 * d * m) + 4 * (3 * d + m)
    # TODO(synk): if bf16 weights ever dominate the budget (huge D*M), switch to
    # a 2-D grid tiling the feature/contraction dim with an f32 accumulator
    # instead of letting tm collapse toward 8.
    avail = max(vmem_budget - fixed, per_row * SUBLANE)
    tm_cap = max(SUBLANE, (avail // per_row) // SUBLANE * SUBLANE)
    tm = max(SUBLANE, min(tm_target, tm_cap, _round_up(n_rows, SUBLANE)))
    if n_rows > 4 * SUBLANE:
        tm = min(tm, max(SUBLANE, _round_up(_cdiv(n_rows, 4), SUBLANE)))
    n_tiles = _cdiv(n_rows, tm)
    if n_tiles > 1 and n_tiles % 2 == 1:
        tm_even = max(SUBLANE, _round_up(_cdiv(n_rows, n_tiles + 1), SUBLANE))
        if _cdiv(n_rows, tm_even) % 2 == 0:
            tm = tm_even
    return tm


# --------------------------------------------------------------------------- #
# Wrappers
# --------------------------------------------------------------------------- #
def prepare_adapter_params(gamma, beta, w1_t, b1, w2_t, b2):
    """One-time parameter prep (hoisted out of the per-forward path):
    bf16 weights (halves weight DMA), f32 (1, F) LN params / biases."""
    return dict(
        gamma=jnp.asarray(gamma, jnp.float32).reshape(1, -1),
        beta=jnp.asarray(beta, jnp.float32).reshape(1, -1),
        w1=jnp.asarray(w1_t, jnp.bfloat16),     # (D, M) = linear_in.weight.T
        b1=jnp.asarray(b1, jnp.float32).reshape(1, -1),
        w2=jnp.asarray(w2_t, jnp.bfloat16),     # (M, D) = linear_out.weight.T
        b2=jnp.asarray(b2, jnp.float32).reshape(1, -1),
    )


@functools.partial(jax.jit,
                   static_argnames=("tm", "vmem_limit", "use_pipeline_mode"))
def _adapter_pallas(x, gamma, beta, w1, b1, w2, b2, *,
                    tm, vmem_limit, use_pipeline_mode):
    B, T, D = x.shape
    M = w1.shape[1]
    N = B * T
    x2 = x.reshape(N, D)

    def inv_spec(shape):
        # Grid-invariant operand (constant index_map) -> single VMEM buffer.
        if use_pipeline_mode:
            return pl.BlockSpec(shape, lambda i: (0, 0),
                                pipeline_mode=pl.Buffered(1))
        return pl.BlockSpec(shape, lambda i: (0, 0))

    if use_pipeline_mode:
        x_spec = pl.BlockSpec((tm, D), lambda i: (i, 0),
                              pipeline_mode=pl.Buffered(3))
    else:
        x_spec = pl.BlockSpec((tm, D), lambda i: (i, 0))

    out = pl.pallas_call(
        adapter_kernel,
        out_shape=jax.ShapeDtypeStruct((N, D), x.dtype),
        grid_spec=pltpu.PrefetchScalarGridSpec(
            num_scalar_prefetch=0,
            grid=(pl.cdiv(N, tm),),          # ragged last tile masked by Pallas
            in_specs=[
                x_spec,                      # x rows
                inv_spec((1, D)),            # LN gamma
                inv_spec((1, D)),            # LN beta
                inv_spec((D, M)),            # W_in^T  (bf16)
                inv_spec((1, M)),            # b_in
                inv_spec((M, D)),            # W_out^T (bf16)
                inv_spec((1, D)),            # b_out
            ],
            out_specs=pl.BlockSpec((tm, D), lambda i: (i, 0)),  # default 2 bufs
        ),
        compiler_params=pltpu.CompilerParams(
            dimension_semantics=("parallel",),
            vmem_limit_bytes=vmem_limit,
        ),
    )(x2, gamma, beta, w1, b1, w2, b2)

    return out.reshape(B, T, D)


def adapter_forward(x, params, *, tm_target=1024, use_pipeline_mode=True):
    """x: (B, T, D); params from prepare_adapter_params."""
    B, T, D = x.shape
    M = params["w1"].shape[1]
    budget, limit = _vmem_caps()
    itemsize = jnp.dtype(x.dtype).itemsize
    tm = _choose_tm(B * T, D, M, itemsize, itemsize, tm_target, budget)
    return _adapter_pallas(x, params["gamma"], params["beta"], params["w1"],
                           params["b1"], params["w2"], params["b2"],
                           tm=tm, vmem_limit=limit,
                           use_pipeline_mode=use_pipeline_mode)


def reference_forward(x, gamma, beta, w1_t, b1, w2_t, b2):
    xf = x.astype(jnp.float32)
    mean = jnp.mean(xf, axis=-1, keepdims=True)
    var = jnp.mean((xf - mean) ** 2, axis=-1, keepdims=True)
    xn = (xf - mean) * jax.lax.rsqrt(var + LN_EPS) * gamma + beta
    h = jnp.maximum(xn @ w1_t + b1, 0.0)
    return (h @ w2_t + b2).astype(x.dtype)


if __name__ == "__main__":
    # Small shapes consistent with the module: input_dim=32, downsample_factor=2.
    batch, seq, input_dim = 2, 8, 32
    downsample_factor = 2
    middle_dim = input_dim // downsample_factor

    key = jax.random.PRNGKey(0)
    kx, kw1, kw2 = jax.random.split(key, 3)

    x = jax.random.normal(kx, (batch, seq, input_dim), dtype=jnp.float32)

    # reset_parameters(): normal(0, 0.02) weights, zero biases; LN affine = id.
    # PyTorch Linear weight is (out, in); the kernel takes the transpose.
    w1 = 0.02 * jax.random.normal(kw1, (middle_dim, input_dim), dtype=jnp.float32)
    w2 = 0.02 * jax.random.normal(kw2, (input_dim, middle_dim), dtype=jnp.float32)
    b1 = jnp.zeros((middle_dim,), jnp.float32)
    b2 = jnp.zeros((input_dim,), jnp.float32)
    gamma = jnp.ones((input_dim,), jnp.float32)
    beta = jnp.zeros((input_dim,), jnp.float32)

    params = prepare_adapter_params(gamma, beta, w1.T, b1, w2.T, b2)

    try:
        out = jax.block_until_ready(adapter_forward(x, params))
    except Exception:
        # Fallback if this jax build rejects pipeline_mode=pl.Buffered(...):
        out = jax.block_until_ready(
            adapter_forward(x, params, use_pipeline_mode=False))

    ref = reference_forward(x, gamma, beta, w1.T, b1, w2.T, b2)
    assert out.shape == (batch, seq, input_dim)
    assert jnp.all(jnp.isfinite(out)), "non-finite output"
    # bf16 matmul operands (f32 accumulation) -> small numeric slack vs f32 ref.
    assert jnp.allclose(out, ref, atol=5e-3, rtol=5e-2), "mismatch vs reference"
    print("KERNEL_OK")
</pallas_src>

<mosaic_0001>
module attributes {stable_mosaic.version = 11 : i64} {
  func.func @adapter_kernel(%arg0: i32, %arg1: memref<16x32xf32, #tpu.memory_space<vmem>>, %arg2: memref<1x32xf32, #tpu.memory_space<vmem>>, %arg3: memref<1x32xf32, #tpu.memory_space<vmem>>, %arg4: memref<32x16xbf16, #tpu.memory_space<vmem>>, %arg5: memref<1x16xf32, #tpu.memory_space<vmem>>, %arg6: memref<16x32xbf16, #tpu.memory_space<vmem>>, %arg7: memref<1x32xf32, #tpu.memory_space<vmem>>, %arg8: memref<16x32xf32, #tpu.memory_space<vmem>>) attributes {dimension_semantics = [#tpu.dimension_semantics<parallel>], iteration_bounds = array<i64: 1>, scalar_prefetch = 0 : i64, scratch_operands = 0 : i64, tpu.core_type = #tpu.core_type<tc>, window_params = [{transform_indices = @transform_0, window_bounds = array<i64: 16, 32>}, {pipeline_mode = #tpu.pipeline_mode<synchronous>, transform_indices = @transform_1, window_bounds = array<i64: 1, 32>}, {pipeline_mode = #tpu.pipeline_mode<synchronous>, transform_indices = @transform_2, window_bounds = array<i64: 1, 32>}, {pipeline_mode = #tpu.pipeline_mode<synchronous>, transform_indices = @transform_3, window_bounds = array<i64: 32, 16>}, {pipeline_mode = #tpu.pipeline_mode<synchronous>, transform_indices = @transform_4, window_bounds = array<i64: 1, 16>}, {pipeline_mode = #tpu.pipeline_mode<synchronous>, transform_indices = @transform_5, window_bounds = array<i64: 16, 32>}, {pipeline_mode = #tpu.pipeline_mode<synchronous>, transform_indices = @transform_6, window_bounds = array<i64: 1, 32>}, {transform_indices = @transform_7, window_bounds = array<i64: 16, 32>}]} {
    %c0 = arith.constant 0 : index
    %c0_0 = arith.constant 0 : index
    %0 = vector.load %arg1[%c0, %c0_0] : memref<16x32xf32, #tpu.memory_space<vmem>>, vector<16x32xf32>
    %cst = arith.constant dense<0.000000e+00> : vector<16xf32>
    %1 = vector.multi_reduction <add>, %0, %cst [1] : vector<16x32xf32> to vector<16xf32>
    %2 = vector.shape_cast %1 : vector<16xf32> to vector<16x1xf32>
    %cst_1 = arith.constant 3.200000e+01 : f32
    %3 = vector.broadcast %cst_1 : f32 to vector<16x1xf32>
    %4 = arith.divf %2, %3 : vector<16x1xf32>
    %5 = arith.mulf %0, %0 : vector<16x32xf32>
    %cst_2 = arith.constant dense<0.000000e+00> : vector<16xf32>
    %6 = vector.multi_reduction <add>, %5, %cst_2 [1] : vector<16x32xf32> to vector<16xf32>
    %7 = vector.shape_cast %6 : vector<16xf32> to vector<16x1xf32>
    %cst_3 = arith.constant 3.200000e+01 : f32
    %8 = vector.broadcast %cst_3 : f32 to vector<16x1xf32>
    %9 = arith.divf %7, %8 : vector<16x1xf32>
    %10 = arith.mulf %4, %4 : vector<16x1xf32>
    %11 = arith.subf %9, %10 : vector<16x1xf32>
    %cst_4 = arith.constant 0.000000e+00 : f32
    %12 = vector.broadcast %cst_4 : f32 to vector<16x1xf32>
    %13 = arith.maximumf %11, %12 : vector<16x1xf32>
    %cst_5 = arith.constant 9.99999974E-6 : f32
    %14 = vector.broadcast %cst_5 : f32 to vector<16x1xf32>
    %15 = arith.addf %13, %14 : vector<16x1xf32>
    %16 = math.rsqrt %15 : vector<16x1xf32>
    %17 = vector.broadcast %4 : vector<16x1xf32> to vector<16x32xf32>
    %18 = arith.subf %0, %17 : vector<16x32xf32>
    %19 = vector.broadcast %16 : vector<16x1xf32> to vector<16x32xf32>
    %20 = arith.mulf %18, %19 : vector<16x32xf32>
    %c0_6 = arith.constant 0 : index
    %c0_7 = arith.constant 0 : index
    %21 = vector.load %arg2[%c0_6, %c0_7] : memref<1x32xf32, #tpu.memory_space<vmem>>, vector<1x32xf32>
    %22 = vector.broadcast %21 : vector<1x32xf32> to vector<16x32xf32>
    %23 = arith.mulf %20, %22 : vector<16x32xf32>
    %c0_8 = arith.constant 0 : index
    %c0_9 = arith.constant 0 : index
    %24 = vector.load %arg3[%c0_8, %c0_9] : memref<1x32xf32, #tpu.memory_space<vmem>>, vector<1x32xf32>
    %25 = vector.broadcast %24 : vector<1x32xf32> to vector<16x32xf32>
    %26 = arith.addf %23, %25 : vector<16x32xf32>
    %27 = arith.truncf %26 : vector<16x32xf32> to vector<16x32xbf16>
    %c0_10 = arith.constant 0 : index
    %c0_11 = arith.constant 0 : index
    %28 = vector.load %arg4[%c0_10, %c0_11] : memref<32x16xbf16, #tpu.memory_space<vmem>>, vector<32x16xbf16>
    %cst_12 = arith.constant dense<0.000000e+00> : vector<16x16xf32>
    %29 = tpu.matmul %27, %28, %cst_12 {dimension_numbers = #tpu.dot_dimension_numbers<[1], [0], [0], [1], [0, 0, 1, 1], [], []>} : vector<16x32xbf16>, vector<32x16xbf16>, vector<16x16xf32> -> vector<16x16xf32>
    %c0_13 = arith.constant 0 : index
    %c0_14 = arith.constant 0 : index
    %30 = vector.load %arg5[%c0_13, %c0_14] : memref<1x16xf32, #tpu.memory_space<vmem>>, vector<1x16xf32>
    %31 = vector.broadcast %30 : vector<1x16xf32> to vector<16x16xf32>
    %32 = arith.addf %29, %31 : vector<16x16xf32>
    %cst_15 = arith.constant 0.000000e+00 : f32
    %33 = vector.broadcast %cst_15 : f32 to vector<16x16xf32>
    %34 = arith.maximumf %32, %33 : vector<16x16xf32>
    %35 = arith.truncf %34 : vector<16x16xf32> to vector<16x16xbf16>
    %c0_16 = arith.constant 0 : index
    %c0_17 = arith.constant 0 : index
    %36 = vector.load %arg6[%c0_16, %c0_17] : memref<16x32xbf16, #tpu.memory_space<vmem>>, vector<16x32xbf16>
    %cst_18 = arith.constant dense<0.000000e+00> : vector<16x32xf32>
    %37 = tpu.matmul %35, %36, %cst_18 {dimension_numbers = #tpu.dot_dimension_numbers<[1], [0], [0], [1], [0, 0, 1, 1], [], []>} : vector<16x16xbf16>, vector<16x32xbf16>, vector<16x32xf32> -> vector<16x32xf32>
    %c0_19 = arith.constant 0 : index
    %c0_20 = arith.constant 0 : index
    %38 = vector.load %arg7[%c0_19, %c0_20] : memref<1x32xf32, #tpu.memory_space<vmem>>, vector<1x32xf32>
    %39 = vector.broadcast %38 : vector<1x32xf32> to vector<16x32xf32>
    %40 = arith.addf %37, %39 : vector<16x32xf32>
    %c0_21 = arith.constant 0 : index
    %c0_22 = arith.constant 0 : index
    %41 = vector.load %arg8[%c0_21, %c0_22] : memref<16x32xf32, #tpu.memory_space<vmem>>, vector<16x32xf32>
    tpu.vector_store %arg8[%c0_21, %c0_22], %40 {strides = array<i32>} : memref<16x32xf32, #tpu.memory_space<vmem>>, vector<16x32xf32>,
    return
  }
  func.func @transform_0(%arg0: i32) -> (i32, i32) {
    %c0_i32 = arith.constant 0 : i32
    %c0_i32_0 = arith.constant 0 : i32
    return %arg0, %c0_i32 : i32, i32
  }
  func.func @transform_1(%arg0: i32) -> (i32, i32) {
    %c0_i32 = arith.constant 0 : i32
    %c0_i32_0 = arith.constant 0 : i32
    %c0_i32_1 = arith.constant 0 : i32
    return %c0_i32, %c0_i32_0 : i32, i32
  }
  func.func @transform_2(%arg0: i32) -> (i32, i32) {
    %c0_i32 = arith.constant 0 : i32
    %c0_i32_0 = arith.constant 0 : i32
    %c0_i32_1 = arith.constant 0 : i32
    return %c0_i32, %c0_i32_0 : i32, i32
  }
  func.func @transform_3(%arg0: i32) -> (i32, i32) {
    %c0_i32 = arith.constant 0 : i32
    %c0_i32_0 = arith.constant 0 : i32
    %c0_i32_1 = arith.constant 0 : i32
    return %c0_i32, %c0_i32_0 : i32, i32
  }
  func.func @transform_4(%arg0: i32) -> (i32, i32) {
    %c0_i32 = arith.constant 0 : i32
    %c0_i32_0 = arith.constant 0 : i32
    %c0_i32_1 = arith.constant 0 : i32
    return %c0_i32, %c0_i32_0 : i32, i32
  }
  func.func @transform_5(%arg0: i32) -> (i32, i32) {
    %c0_i32 = arith.constant 0 : i32
    %c0_i32_0 = arith.constant 0 : i32
    %c0_i32_1 = arith.constant 0 : i32
    return %c0_i32, %c0_i32_0 : i32, i32
  }
  func.func @transform_6(%arg0: i32) -> (i32, i32) {
    %c0_i32 = arith.constant 0 : i32
    %c0_i32_0 = arith.constant 0 : i32
    %c0_i32_1 = arith.constant 0 : i32
    return %c0_i32, %c0_i32_0 : i32, i32
  }
  func.func @transform_7(%arg0: i32) -> (i32, i32) {
    %c0_i32 = arith.constant 0 : i32
    %c0_i32_0 = arith.constant 0 : i32
    return %arg0, %c0_i32 : i32, i32
  }
}

</mosaic_0001>

<bundles_post_ra>
// kernel: _adapter_pallas.1
= control target key start
LH: loop header
LB: loop body
LE: loop exit
PB: predicated region body
PF: predicated region fallthrough
CT: control target
= control target key end

     0   :  { %vm30_vm0 = vcmask 261120   ;;  %s341_s0 = inlined_call_operand.vmem [shape: f32[16,32], index: 0, kind: input, shape index: {}]   ;;  %s342_s1 = inlined_call_operand.vmem [shape: f32[1,32], index: 1, kind: input, shape index: {}]   ;;  %s343_s2 = inlined_call_operand.vmem [shape: f32[1,32], index: 2, kind: input, shape index: {}]   ;;  %s344_s3 = inlined_call_operand.vmem [shape: bf16[32,16], index: 3, kind: input, shape index: {}]   ;;  %s345_s4 = inlined_call_operand.vmem [shape: f32[1,16], index: 4, kind: input, shape index: {}]   ;;  %s346_s5 = inlined_call_operand.vmem [shape: bf16[16,32], index: 5, kind: input, shape index: {}]   ;;  %s347_s6 = inlined_call_operand.vmem [shape: f32[1,32], index: 6, kind: input, shape index: {}]   ;;  %s348_s7 = inlined_call_operand.hbm [shape: f32[16,32], index: 7, kind: output, shape index: {}]  }
   0x1   :  { %v295_v0 = vld [vmem:[%s341_s0] sm:$0xff]  ;;  %v304_v3 = vld [vmem:[%s341_s0 + $0x8] sm:$0xff] }
   0x2   :  { %v31_v1 = vsel %vm30_vm0, %v295_v0, 0.0  ;;  %v46_v2 = vmul.f32 %v295_v0, %v295_v0 }
   0x3   :  { %32 = vadd.xlane.f32.xlu0 %v31_v1 }
   0x4   :  { %12 = vsyncpa [#allocation3], 0  ;;  %v48_v4 = vsel %vm30_vm0, %v46_v2, 0.0  ;;  %v47_v5 = vmul.f32 %v304_v3, %v304_v3  ;;  %v34_v6 = vsel %vm30_vm0, %v304_v3, 0.0  ;;  %v248_v8 = vmov 32.0   ;;  %v206_v20 = vld [vmem:[%s344_s3 + $0x8] sm:$0xff] }
   0x5   :  { %49 = vadd.xlane.f32.xlu1 %v48_v4  ;;  %216 = vrcp.f32 %v248_v8  ;;  %130 = vmatpush.bf16.msra.mxu0 %v206_v20  ;;  %v205_v22 = vld [vmem:[%s344_s3] sm:$0xff]  ;;  %vm153_vm8 = vcmask 130048   ;;  %s179_s17 = sshll.u32 %s348_s7, 4  ;;  %s250_s18 = smov 128   ;;  %s180_s17 = int_to_ptr.hbm [resolvable:$true] %s179_s17 }
   0x6   :  { %v51_v7 = vsel %vm30_vm0, %v47_v5, 0.0  ;;  %v212_v47 = vld [vmem:[%s342_s1] ss:$0 sm:$0xff]  ;;  %s251_s19 = smov 8  }
   0x7   :  { %v213_v53 = vld [vmem:[%s343_s2] ss:$0 sm:$0xff] }
   0x8   :  { %v207_v58 = vld [vmem:[%s346_s5] sm:$0xff]  ;;  %s249_s5 = smov [#allocation2]  }
   0x9   :  { %131 = vmatpush.bf16.msra.mxu0 %v205_v22  ;;  %164 = vmatpush.bf16.msra.mxu1 %v207_v58  ;;  %v214_v60 = vld [vmem:[%s345_s4] ss:$0 sm:$0xff]  ;;  %s177_s15 = sshll.u32 %s249_s5, 4  ;;  %s178_s15 = int_to_ptr.vmem [resolvable:$true] %s177_s15 }
   0xb   :  { %35 = vadd.xlane.f32.xlu0 %v34_v6  ;;  %v217_v9 = vpop.eup %216 }
   0xc   :  { %v38_v10 = vmul.f32 32.0, %v217_v9  ;;  %vm42_vm1 = vweird.f32 %v217_v9 }
   0xd   :  { %52 = vadd.xlane.f32.xlu1 %v51_v7 }
   0xe   :  { %v39_v11 = vsub.f32 1.0, %v38_v10 }
  0x10   :  { %v40_v12 = vmul.f32 %v217_v9, %v39_v11 }
  0x12   :  { %v41_v13 = vadd.f32 %v217_v9, %v40_v12 }
  0x14   :  { %v43_v14 = vsel %vm42_vm1, %v217_v9, %v41_v13 }
  0x76   :  { %v33_v15 = vpop.xlane.xlu0 %32 }
  0x77   :  { %v44_v16 = vmul.f32 %v43_v14, %v33_v15 }
  0x78   :  { %v50_v17 = vpop.xlane.xlu1 %49 }
  0x79   :  { %v56_v18 = vmul.f32 %v44_v16, %v44_v16  ;;  %v54_v19 = vmul.f32 %v50_v17, %v43_v14  ;;  %v84_v44 = vsub.f32 %v295_v0, %v44_v16 }
  0x7b   :  { %v58_v21 = vsub.f32 %v54_v19, %v56_v18 }
  0x7d   :  { %v60_v23 = vmax.f32 %v58_v21, 0.0 }
  0x7e   :  { %v36_v24 = vpop.xlane.xlu0 %35 }
  0x7f   :  { %v62_v25 = vadd.f32 1e-05, %v60_v23  ;;  %v45_v26 = vmul.f32 %v43_v14, %v36_v24 }
  0x80   :  { %v53_v27 = vpop.xlane.xlu1 %52 }
  0x81   :  { %218 = vrsqrt.f32 %v62_v25  ;;  %v57_v28 = vmul.f32 %v45_v26, %v45_v26  ;;  %v55_v29 = vmul.f32 %v53_v27, %v43_v14  ;;  %vm70_vm3 = vweird.f32 %v62_v25 }
  0x82   :  { %v85_v49 = vsub.f32 %v304_v3, %v45_v26  ;;  %v215_v3 = vld [vmem:[%s347_s6] ss:$0 sm:$0xff] }
  0x83   :  { %v59_v30 = vsub.f32 %v55_v29, %v57_v28 }
  0x85   :  { %v61_v31 = vmax.f32 %v59_v30, 0.0 }
  0x87   :  { %v219_v32 = vpop.eup %218  ;;  %v63_v34 = vadd.f32 1e-05, %v61_v31 }
  0x88   :  { %v65_v33 = vmul.f32 %v219_v32, %v62_v25  ;;  %vm71_vm2 = vweird.f32 %v219_v32 }
  0x89   :  { %220 = vrsqrt.f32 %v63_v34  ;;  %vm72_vm4 = vmor %vm70_vm3, %vm71_vm2  ;;  %vm80_vm6 = vweird.f32 %v63_v34 }
  0x8a   :  { %v66_v35 = vmul.f32 %v219_v32, %v65_v33 }
  0x8c   :  { %v67_v36 = vmul.f32 0.5, %v66_v35 }
  0x8e   :  { %v68_v37 = vsub.f32 1.5, %v67_v36 }
  0x8f   :  { %v221_v38 = vpop.eup %220 }
  0x90   :  { %v69_v39 = vmul.f32 %v219_v32, %v68_v37  ;;  %v75_v40 = vmul.f32 %v221_v38, %v63_v34  ;;  %vm81_vm5 = vweird.f32 %v221_v38 }
  0x91   :  { %vm82_vm7 = vmor %vm80_vm6, %vm81_vm5 }
  0x92   :  { %v76_v41 = vmul.f32 %v221_v38, %v75_v40  ;;  %v73_v43 = vsel %vm72_vm4, %v219_v32, %v69_v39 }
  0x93   :  { %v86_v46 = vmul.f32 %v84_v44, %v73_v43 }
  0x94   :  { %v77_v42 = vmul.f32 0.5, %v76_v41 }
  0x95   :  { %v92_v52 = vmul.f32 %v212_v47, %v86_v46 }
  0x96   :  { %v78_v45 = vsub.f32 1.5, %v77_v42 }
  0x97   :  { %v98_v55 = vadd.f32 %v213_v53, %v92_v52 }
  0x98   :  { %v79_v48 = vmul.f32 %v221_v38, %v78_v45 }
  0x9a   :  { %v83_v50 = vsel %vm82_vm7, %v221_v38, %v79_v48 }
  0x9b   :  { %v87_v51 = vmul.f32 %v85_v49, %v83_v50 }
  0x9d   :  { %v93_v54 = vmul.f32 %v212_v47, %v87_v51 }
  0x9f   :  { %v99_v56 = vadd.f32 %v213_v53, %v93_v54 }
  0xa1   :  { %v100_v57 = vpack.c.bf16 %v99_v56, %v98_v55 }
  0xa3   :  { %199 = vmatmul.msk.bf16.vlgmr.msra.gmra.mxu0 %vm30_vm0, %v100_v57 }
 0x120   :  { %v133_v59 = vpop.f32.mrf.mxu0 }
 0x121   :  { %v134_v61 = vadd.f32 %v214_v60, %v133_v59 }
 0x123   :  { %v138_v0 = vmax.f32 %v134_v61, 0.0 }
 0x128   :  { %v135_v62 = vpop.f32.mrf.mxu0 }
 0x129   :  { %v136_v63 = vadd.f32 %v214_v60, %v135_v62 }
 0x12b   :  { %v139_v1 = vmax.f32 %v136_v63, 0.0 }
 0x12d   :  { %v140_v2 = vpack.c.bf16 %v139_v1, %v138_v0 }
 0x12f   :  { %204 = vmatmul.msk.bf16.vlgmr.msra.gmra.mxu1 %vm153_vm8, %v140_v2 }
 0x1ac   :  { %v166_v4 = vpop.f32.mrf.mxu1 }
 0x1ad   :  { %v167_v5 = vadd.f32 %v215_v3, %v166_v4 }
 0x1af   :  { %171 = vst.msk [vmem:[#allocation2] sm:$0xff] %vm30_vm0, %v167_v5 }
 0x1b4   :  { %v168_v6 = vpop.f32.mrf.mxu1 }
 0x1b5   :  { %v169_v7 = vadd.f32 %v215_v3, %v168_v6 }
 0x1b7   :  { %172 = vst.msk [vmem:[#allocation2 + $0x8] sm:$0xff] %vm30_vm0, %v169_v7 }
 0x1b8   :  { %185 = dma.vmem_to_hbm [thread:$0]  %s178_s15, 256, %s180_s17, [#allocation3], %s250_s18, %s250_s18, %s251_s19  }
 0x1b9   :  { %246 = dma.done.wait [#allocation3], 256  }
 0x1ba   :  { %247 = vsyncadd [#allocation3], 4294967040 }
 0x1bb   :  { %190 = vsyncpa [#allocation3], 1 }

</bundles_post_ra>
